<compile_context>
chip_gen: v6e
topology: v6e:2x2x1
jax: 0.10.0
libtpu: 0.0.40
codegen_flags: <defaults>
</compile_context>

<pallas_src>
import math

import jax
import jax.numpy as jnp
from jax.experimental import pallas as pl
from jax.experimental.pallas import tpu as pltpu


def make_positional_encoding(hidden_size: int, max_len: int = 5000,
                             dtype=jnp.float32) -> jnp.ndarray:
    """Deterministic pe buffer, identical to the PyTorch __init__ (shape (1, max_len, H))."""
    position = jnp.arange(0, max_len, dtype=jnp.float32)[:, None]           # (max_len, 1)
    div_term = jnp.exp(
        jnp.arange(0, hidden_size, 2, dtype=jnp.float32)
        * (-math.log(10000.0) / hidden_size)
    )                                                                        # (H/2,)
    angles = position * div_term                                             # (max_len, H/2)
    pe = jnp.zeros((max_len, hidden_size), dtype=jnp.float32)
    pe = pe.at[:, 0::2].set(jnp.sin(angles))
    pe = pe.at[:, 1::2].set(jnp.cos(angles))
    return pe[None, :, :].astype(dtype)                                      # (1, max_len, H)


def _pe_add_kernel(x_ref, pe_ref, o_ref):
    # x_ref: (TB, S*H) lane-dense tile; pe_ref: (1, S*H) shared table,
    # broadcast over the TB sublane rows by the VPU add.
    o_ref[...] = x_ref[...] + pe_ref[...]


def _choose_batch_tile(batch: int, row_bytes: int, target_tile_bytes: int) -> int:
    """Pick TB rows per grid step: full batch if it fits the target, else a multiple of 8."""
    rows = max(1, target_tile_bytes // max(row_bytes, 1))
    if rows >= batch:
        return batch                       # single (or few) big tiles; full extent is always legal
    tb = (rows // 8) * 8                   # sublane-aligned block height
    if tb < 8:
        return batch if batch < 8 else 8   # tiny rows: fall back to 8 (or full extent)
    return min(tb, batch)


def positional_encoding_forward(x: jnp.ndarray, pe: jnp.ndarray, *,
                                target_tile_bytes: int = 1 << 20) -> jnp.ndarray:
    """x: (B, S, H);  pe: (1, max_len, H).  Returns x + pe[:, :S] (broadcast over B)."""
    B, S, H = x.shape
    N = S * H
    itemsize = jnp.dtype(x.dtype).itemsize

    # pe[:, :S] in x.dtype (halves pe DMA bytes when x is bf16); layout plumbing, not compute.
    pe_slice = jax.lax.slice(pe, (0, 0, 0), (1, S, H)).astype(x.dtype)

    # Lane-dense 2-D views: last dim is S*H (full 128-lane vregs when S*H % 128 == 0)
    # instead of H, so stores are unmasked full-width vst.
    x2 = x.reshape(B, N)
    pe2 = pe_slice.reshape(1, N)

    tb = _choose_batch_tile(B, N * itemsize, target_tile_bytes)
    grid = (pl.cdiv(B, tb),)

    cost = pl.CostEstimate(
        flops=B * N,                                            # one add per element
        transcendentals=0,
        bytes_accessed=2 * B * N * itemsize + N * itemsize,     # read x + write out + read pe
    )

    out2 = pl.pallas_call(
        _pe_add_kernel,
        out_shape=jax.ShapeDtypeStruct((B, N), x.dtype),
        grid_spec=pltpu.PrefetchScalarGridSpec(
            num_scalar_prefetch=0,
            grid=grid,
            in_specs=[
                pl.BlockSpec((tb, N), lambda b: (b, 0)),        # TB-row chunk of x
                pl.BlockSpec((1, N), lambda b: (0, 0)),         # pe tile reused every step
            ],
            out_specs=pl.BlockSpec((tb, N), lambda b: (b, 0)),
        ),
        compiler_params=pltpu.CompilerParams(
            dimension_semantics=("parallel",),                  # lets v7x shard chunks across its 2 TCs
        ),
        cost_estimate=cost,
        input_output_aliases={0: 0},                            # write back into x's buffer (peak-mem win)
    )(x2, pe2)

    return out2.reshape(B, S, H)


if __name__ == "__main__":
    B, S, H = 2, 8, 32
    MAX_LEN = 5000

    key = jax.random.PRNGKey(0)
    x = jax.random.normal(key, (B, S, H), dtype=jnp.float32)

    pe = make_positional_encoding(H, MAX_LEN)

    # Small-shape run: single lane-dense (B, S*H) tile, grid = (1,).
    out = jax.block_until_ready(positional_encoding_forward(x, pe))
    ref = x + pe[:, :S]
    assert out.shape == (B, S, H)
    assert jnp.allclose(out, ref, atol=1e-6), "mismatch vs reference (small)"

    # Multi-tile run: force TB=8, grid=(2,) to exercise the batched-tiling path.
    x_big = jax.random.normal(jax.random.PRNGKey(1), (16, S, H), dtype=jnp.float32)
    out_big = jax.block_until_ready(
        positional_encoding_forward(x_big, pe, target_tile_bytes=8 * S * H * 4)
    )
    ref_big = x_big + pe[:, :S]
    assert jnp.allclose(out_big, ref_big, atol=1e-6), "mismatch vs reference (tiled)"

    print("KERNEL_OK")
</pallas_src>

<mosaic_0001>
module attributes {stable_mosaic.version = 11 : i64} {
  func.func @_pe_add_kernel(%arg0: i32, %arg1: memref<2x256xf32, #tpu.memory_space<vmem>>, %arg2: memref<1x256xf32, #tpu.memory_space<vmem>>, %arg3: memref<2x256xf32, #tpu.memory_space<vmem>>) attributes {dimension_semantics = [#tpu.dimension_semantics<parallel>], iteration_bounds = array<i64: 1>, scalar_prefetch = 0 : i64, scratch_operands = 0 : i64, tpu.core_type = #tpu.core_type<tc>, window_params = [{transform_indices = @transform_0, window_bounds = array<i64: 2, 256>}, {pipeline_mode = #tpu.pipeline_mode<synchronous>, transform_indices = @transform_1, window_bounds = array<i64: 1, 256>}, {transform_indices = @transform_2, window_bounds = array<i64: 2, 256>}]} {
    %c0 = arith.constant 0 : index
    %c0_0 = arith.constant 0 : index
    %0 = vector.load %arg1[%c0, %c0_0] : memref<2x256xf32, #tpu.memory_space<vmem>>, vector<2x256xf32>
    %c0_1 = arith.constant 0 : index
    %c0_2 = arith.constant 0 : index
    %1 = vector.load %arg2[%c0_1, %c0_2] : memref<1x256xf32, #tpu.memory_space<vmem>>, vector<1x256xf32>
    %2 = vector.broadcast %1 : vector<1x256xf32> to vector<2x256xf32>
    %3 = arith.addf %0, %2 : vector<2x256xf32>
    %c0_3 = arith.constant 0 : index
    %c0_4 = arith.constant 0 : index
    %4 = vector.load %arg3[%c0_3, %c0_4] : memref<2x256xf32, #tpu.memory_space<vmem>>, vector<2x256xf32>
    tpu.vector_store %arg3[%c0_3, %c0_4], %3 {strides = array<i32>} : memref<2x256xf32, #tpu.memory_space<vmem>>, vector<2x256xf32>,
    return
  }
  func.func @transform_0(%arg0: i32) -> (i32, i32) {
    %c0_i32 = arith.constant 0 : i32
    %c0_i32_0 = arith.constant 0 : i32
    return %arg0, %c0_i32 : i32, i32
  }
  func.func @transform_1(%arg0: i32) -> (i32, i32) {
    %c0_i32 = arith.constant 0 : i32
    %c0_i32_0 = arith.constant 0 : i32
    %c0_i32_1 = arith.constant 0 : i32
    return %c0_i32, %c0_i32_0 : i32, i32
  }
  func.func @transform_2(%arg0: i32) -> (i32, i32) {
    %c0_i32 = arith.constant 0 : i32
    %c0_i32_0 = arith.constant 0 : i32
    return %arg0, %c0_i32 : i32, i32
  }
}

</mosaic_0001>

<bundles_post_ra>
// kernel: tpu_custom_call.1
= control target key start
LH: loop header
LB: loop body
LE: loop exit
PB: predicated region body
PF: predicated region fallthrough
CT: control target
= control target key end

     0   :  { %7 = vsyncpa [#allocation3], 0  ;;  %s135_s0 = inlined_call_operand.hbm [shape: f32[2,256], index: 0, kind: input, shape index: {}, may-alias: {0,2}]   ;;  %s136_s1 = inlined_call_operand.vmem [shape: f32[1,256], index: 1, kind: input, shape index: {}]   ;;  %s137_s2 = inlined_call_operand.hbm [shape: f32[2,256], index: 2, kind: output, shape index: {}, may-alias: {0,2}]  }
   0x1   :  { %8 = vsyncpa [#allocation4], 0  ;;  %s108_s9 = smov [#allocation2]  }
   0x2   :  { %s15_s10 = sshll.u32 %s108_s9, 4  ;;  %s16_s10 = int_to_ptr.vmem [resolvable:$true] %s15_s10 }
   0x3   :  { %s72_s11 = scalar_lea.vmem %s16_s10, 64  ;;  %p77_p1 = scmp.lt.s32.totalorder %s16_s10, %s16_s10 }
   0x4   :  { %p73_p0 = scmp.ne.s32.totalorder %s16_s10, %s72_s11  ;;  %p78_p2 = scmp.lt.s32.totalorder %s72_s11, %s72_s11 }
   0x6   :  { %p79_p3 = por %p78_p2, %p77_p1 }
   0x8   :  { %p80_p4 = pnand %p79_p3, %p73_p0 }
   0xa   :  { %83 = shalt.err (!%p80_p4)
}
   0xb   :  { %18 = dma.hbm_to_vmem [thread:$0]  %s135_s0, 64, %s16_s10, [#allocation3]  }
   0xc   :  { %104 = dma.done.wait [#allocation3], 64  }
   0xd   :  { %105 = vsyncadd [#allocation3], 4294967232  ;;  %v27_v0 = vlaneseq  ;;  %v109_v1 = vmov 1983009808   ;;  %v25_v7 = vld [vmem:[%s136_s1] sm:$0x3] }
   0xe   :  { %v37_v2 = vunpack.c.l.s4 %v109_v1  ;;  %v24_v12 = vld [vmem:[#allocation2] sm:$0xf]  ;;  %s110_s16 = smov [#allocation5]  }
   0xf   :  { %v28_v3 = vshrl.u32 %v27_v0, 7  ;;  %s52_s0 = sshll.u32 %s110_s16, 4  ;;  %s53_s0 = int_to_ptr.vmem [resolvable:$true] %s52_s0 }
  0x10   :  { %v38_v6 = vunpack.c.0.s8 %v37_v2  ;;  %s84_s17 = scalar_lea.vmem %s53_s0, 64  ;;  %p89_p6 = scmp.lt.s32.totalorder %s53_s0, %s53_s0 }
  0x11   :  { %v29_v4 = vsub.s32 0, %v28_v3  ;;  %v33_v5 = vsub.s32 1, %v28_v3  ;;  %p85_p5 = scmp.ne.s32.totalorder %s53_s0, %s84_s17  ;;  %p90_p7 = scmp.lt.s32.totalorder %s84_s17, %s84_s17 }
  0x12   :  { %v41_v10 = vsub.s32 %v38_v6, %v28_v3 }
  0x13   :  { %v30_v8 = vrot.slane %v25_v7, %v29_v4  ;;  %v34_v9 = vrot.slane %v25_v7, %v33_v5  ;;  %p91_p8 = por %p90_p7, %p89_p6 }
  0x15   :  { %v35_v11 = vcombine.low %v30_v8, %v34_v9  ;;  %p92_p9 = pnand %p91_p8, %p85_p5 }
  0x17   :  { %v42_v13 = vrot.slane %v35_v11, %v41_v10 }
  0x19   :  { %v44_v14 = vadd.f32 %v42_v13, %v24_v12 }
  0x1b   :  { %45 = vst [vmem:[#allocation5] sm:$0xf] %v44_v14 }
  0x1c   :  { %95 = shalt.err (!%p92_p9)
}
  0x1d   :  { %55 = dma.vmem_to_hbm [thread:$0]  %s53_s0, 64, %s137_s2, [#allocation4]  }
  0x1e   :  { %106 = dma.done.wait [#allocation4], 64  }
  0x1f   :  { %107 = vsyncadd [#allocation4], 4294967232 }
  0x20   :  { %59 = vsyncpa [#allocation3], 1 }
  0x21   :  { %60 = vsyncpa [#allocation4], 1 }

</bundles_post_ra>
